<compile_context>
chip_gen: v5e
topology: v5e:2x2
jax: 0.10.0
libtpu: 0.0.40
codegen_flags: <defaults>
</compile_context>

<pallas_src>
import jax
import jax.numpy as jnp
import numpy as np
from jax.experimental import pallas as pl
from jax.experimental.pallas import tpu as pltpu


def _round_up(x, m):
    return ((x + m - 1) // m) * m


def _pick_tile_n(n, max_tile=256):
    """Largest row-tile that divides n, is a multiple of 8, and leaves >=2 grid steps."""
    divisors = [t for t in range(8, min(n // 2, max_tile) + 1, 8) if n % t == 0]
    if divisors:
        return max(divisors)          # no row padding, >=2 grid steps (v7x megacore)
    if n % 8 == 0 and n <= max_tile:
        return n                      # single tile
    return min(_round_up(n, 8), max_tile)  # tiny row pad on the pooled tensor only


def _ga_mlp_kernel(x_ref, w_ref, b_ref, o_ref):
    """Fused (conv1+bn1) -> ReLU -> (conv2+bn2+conv3) on pooled rows.

    x_ref : (tile_n, Cp)   rows = pooled spatial positions, lanes = channels
    w_ref : (2, Cp, Cp)    [0] = folded conv1*bn1, [1] = folded conv2*bn2*conv3, (in, out)
    b_ref : (2, Cp)        matching folded biases
    o_ref : (tile_n, Cp)
    """
    x = x_ref[...].astype(jnp.float32)
    h = jnp.dot(x, w_ref[0], preferred_element_type=jnp.float32) + b_ref[0:1, :]
    h = jnp.maximum(h, 0.0)                                          # ReLU
    out = jnp.dot(h, w_ref[1], preferred_element_type=jnp.float32) + b_ref[1:2, :]
    o_ref[...] = out.astype(o_ref.dtype)


def _fold_params(p, C, Cp, eps):
    """Fold eval-mode BN into the 1x1 convs, fuse conv2/bn2 with conv3, pad to Cp lanes."""
    s1 = p["gamma1"] / jnp.sqrt(p["var1"] + eps)
    w1f = (p["w1"].T * s1[None, :]).astype(jnp.float32)              # (in, out)
    b1f = ((p["b1"] - p["mean1"]) * s1 + p["beta1"]).astype(jnp.float32)

    s2 = p["gamma2"] / jnp.sqrt(p["var2"] + eps)
    w2f = p["w2"].T * s2[None, :]
    b2f = (p["b2"] - p["mean2"]) * s2 + p["beta2"]
    w3f = p["w3"].T
    # No nonlinearity between (conv2+bn2) and conv3 -> exact algebraic fusion.
    w23f = (w2f @ w3f).astype(jnp.float32)                           # (in, out)
    b23f = (b2f @ w3f + p["b3"]).astype(jnp.float32)

    def pad_w(w):
        if Cp == C:
            return w
        return jnp.zeros((Cp, Cp), jnp.float32).at[:C, :C].set(w)

    def pad_b(b):
        if Cp == C:
            return b
        return jnp.zeros((Cp,), jnp.float32).at[:C].set(b)

    ws = jnp.stack([pad_w(w1f), pad_w(w23f)])                        # (2, Cp, Cp)
    bs = jnp.stack([pad_b(b1f), pad_b(b23f)])                        # (2, Cp)
    return ws, bs


def global_attention(x, params, num_partitions=(8, 8), eps=1e-5, max_tile_n=256):
    B, C, H, W = x.shape
    hp, wp = num_partitions
    # TODO(synk): non-divisible adaptive-pool windows (overlapping floor/ceil bins) not handled.
    assert H % hp == 0 and W % wp == 0, "kernel assumes evenly divisible pooling"
    kh, kw = H // hp, W // wp

    # Adaptive average pool: fused reshape+mean on the native NCHW layout — XLA reads x
    # from HBM exactly once and emits only the tiny (B, C, hp, wp) pooled tensor.
    pooled = x.reshape(B, C, hp, kh, wp, kw).mean(axis=(3, 5)).astype(jnp.float32)

    N = B * hp * wp
    pooled_rows = pooled.transpose(0, 2, 3, 1).reshape(N, C)         # tiny: N x C

    # Lane-dense channel width (multiple of 128) and row tiling.
    Cp = max(128, _round_up(C, 128))
    tile_n = _pick_tile_n(N, max_tile_n)
    n_pad = _round_up(N, tile_n)
    if Cp != C or n_pad != N:
        pooled_rows = jnp.pad(pooled_rows, ((0, n_pad - N), (0, Cp - C)))

    ws, bs = _fold_params(params, C, Cp, eps)

    out_flat = pl.pallas_call(
        _ga_mlp_kernel,
        out_shape=jax.ShapeDtypeStruct((n_pad, Cp), jnp.float32),
        grid_spec=pltpu.PrefetchScalarGridSpec(
            num_scalar_prefetch=0,
            grid=(n_pad // tile_n,),
            in_specs=[
                pl.BlockSpec((tile_n, Cp), lambda i: (i, 0)),
                pl.BlockSpec((2, Cp, Cp), lambda i: (0, 0, 0)),
                pl.BlockSpec((2, Cp), lambda i: (0, 0)),
            ],
            out_specs=pl.BlockSpec((tile_n, Cp), lambda i: (i, 0)),
        ),
        compiler_params=pltpu.CompilerParams(dimension_semantics=("parallel",)),
    )(pooled_rows, ws, bs)

    # (n_pad, Cp) -> (B, C, hp, wp): slice off row/channel padding, back to NCHW.
    out = out_flat[:N, :C].reshape(B, hp, wp, C).transpose(0, 3, 1, 2)
    return out.astype(x.dtype)


def init_params(key, C):
    ks = jax.random.split(key, 14)
    n = lambda k, s: jax.random.normal(k, s, jnp.float32) * 0.1
    return dict(
        w1=n(ks[0], (C, C)), b1=n(ks[1], (C,)),
        gamma1=1.0 + n(ks[2], (C,)), beta1=n(ks[3], (C,)),
        mean1=n(ks[4], (C,)), var1=1.0 + jnp.abs(n(ks[5], (C,))),
        w2=n(ks[6], (C, C)), b2=n(ks[7], (C,)),
        gamma2=1.0 + n(ks[8], (C,)), beta2=n(ks[9], (C,)),
        mean2=n(ks[10], (C,)), var2=1.0 + jnp.abs(n(ks[11], (C,))),
        w3=n(ks[12], (C, C)), b3=n(ks[13], (C,)),
    )


def reference(x, p, num_partitions=(8, 8), eps=1e-5):
    """Pure-JAX reference mirroring the PyTorch forward (eval-mode BN)."""
    B, C, H, W = x.shape
    hp, wp = num_partitions
    kh, kw = H // hp, W // wp
    pooled = x.reshape(B, C, hp, kh, wp, kw).mean(axis=(3, 5))       # adaptive_avg_pool2d

    def conv1x1(t, w, b):
        return jnp.einsum("bchw,oc->bohw", t, w) + b[None, :, None, None]

    def bn(t, g, be, m, v):
        return (t - m[None, :, None, None]) / jnp.sqrt(v[None, :, None, None] + eps) \
               * g[None, :, None, None] + be[None, :, None, None]

    h = conv1x1(pooled, p["w1"], p["b1"])
    h = jax.nn.relu(bn(h, p["gamma1"], p["beta1"], p["mean1"], p["var1"]))
    h = bn(conv1x1(h, p["w2"], p["b2"]), p["gamma2"], p["beta2"], p["mean2"], p["var2"])
    return conv1x1(h, p["w3"], p["b3"])


if __name__ == "__main__":
    key = jax.random.PRNGKey(0)
    kx, kp = jax.random.split(key)

    B, C, H, W = 2, 4, 16, 16
    num_partitions = (8, 8)

    x = jax.random.normal(kx, (B, C, H, W), jnp.float32)
    params = init_params(kp, C)

    fn = jax.jit(global_attention, static_argnums=(2,))
    out = jax.block_until_ready(fn(x, params, num_partitions))
    assert out.shape == (B, C, num_partitions[0], num_partitions[1])

    ref = reference(x, params, num_partitions)
    np.testing.assert_allclose(np.asarray(out), np.asarray(ref), rtol=1e-4, atol=1e-4)

    print("KERNEL_OK")
</pallas_src>

<mosaic_0001>
module attributes {stable_mosaic.version = 11 : i64} {
  func.func @_ga_mlp_kernel(%arg0: i32, %arg1: memref<64x128xf32, #tpu.memory_space<vmem>>, %arg2: memref<2x128x128xf32, #tpu.memory_space<vmem>>, %arg3: memref<2x128xf32, #tpu.memory_space<vmem>>, %arg4: memref<64x128xf32, #tpu.memory_space<vmem>>) attributes {dimension_semantics = [#tpu.dimension_semantics<parallel>], iteration_bounds = array<i64: 2>, scalar_prefetch = 0 : i64, scratch_operands = 0 : i64, tpu.core_type = #tpu.core_type<tc>, window_params = [{transform_indices = @transform_0, window_bounds = array<i64: 64, 128>}, {pipeline_mode = #tpu.pipeline_mode<synchronous>, transform_indices = @transform_1, window_bounds = array<i64: 2, 128, 128>}, {pipeline_mode = #tpu.pipeline_mode<synchronous>, transform_indices = @transform_2, window_bounds = array<i64: 2, 128>}, {transform_indices = @transform_3, window_bounds = array<i64: 64, 128>}]} {
    %c0 = arith.constant 0 : index
    %c0_0 = arith.constant 0 : index
    %0 = vector.load %arg1[%c0, %c0_0] : memref<64x128xf32, #tpu.memory_space<vmem>>, vector<64x128xf32>
    %c0_1 = arith.constant 0 : index
    %c0_2 = arith.constant 0 : index
    %c0_3 = arith.constant 0 : index
    %1 = vector.load %arg2[%c0_1, %c0_2, %c0_3] : memref<2x128x128xf32, #tpu.memory_space<vmem>>, vector<1x128x128xf32>
    %2 = vector.shape_cast %1 : vector<1x128x128xf32> to vector<128x128xf32>
    %cst = arith.constant dense<0.000000e+00> : vector<64x128xf32>
    %3 = tpu.matmul %0, %2, %cst {dimension_numbers = #tpu.dot_dimension_numbers<[1], [0], [0], [1], [0, 0, 1, 1], [], []>} : vector<64x128xf32>, vector<128x128xf32>, vector<64x128xf32> -> vector<64x128xf32>
    %c0_4 = arith.constant 0 : index
    %c0_5 = arith.constant 0 : index
    %4 = vector.load %arg3[%c0_4, %c0_5] : memref<2x128xf32, #tpu.memory_space<vmem>>, vector<1x128xf32>
    %5 = vector.broadcast %4 : vector<1x128xf32> to vector<64x128xf32>
    %6 = arith.addf %3, %5 : vector<64x128xf32>
    %cst_6 = arith.constant 0.000000e+00 : f32
    %7 = vector.broadcast %cst_6 : f32 to vector<64x128xf32>
    %8 = arith.maximumf %6, %7 : vector<64x128xf32>
    %c1 = arith.constant 1 : index
    %c0_7 = arith.constant 0 : index
    %c0_8 = arith.constant 0 : index
    %9 = vector.load %arg2[%c1, %c0_7, %c0_8] : memref<2x128x128xf32, #tpu.memory_space<vmem>>, vector<1x128x128xf32>
    %10 = vector.shape_cast %9 : vector<1x128x128xf32> to vector<128x128xf32>
    %cst_9 = arith.constant dense<0.000000e+00> : vector<64x128xf32>
    %11 = tpu.matmul %8, %10, %cst_9 {dimension_numbers = #tpu.dot_dimension_numbers<[1], [0], [0], [1], [0, 0, 1, 1], [], []>} : vector<64x128xf32>, vector<128x128xf32>, vector<64x128xf32> -> vector<64x128xf32>
    %c1_10 = arith.constant 1 : index
    %c0_11 = arith.constant 0 : index
    %12 = vector.load %arg3[%c1_10, %c0_11] : memref<2x128xf32, #tpu.memory_space<vmem>>, vector<1x128xf32>
    %13 = vector.broadcast %12 : vector<1x128xf32> to vector<64x128xf32>
    %14 = arith.addf %11, %13 : vector<64x128xf32>
    %c0_12 = arith.constant 0 : index
    %c0_13 = arith.constant 0 : index
    %15 = vector.load %arg4[%c0_12, %c0_13] : memref<64x128xf32, #tpu.memory_space<vmem>>, vector<64x128xf32>
    tpu.vector_store %arg4[%c0_12, %c0_13], %14 {strides = array<i32>} : memref<64x128xf32, #tpu.memory_space<vmem>>, vector<64x128xf32>,
    return
  }
  func.func @transform_0(%arg0: i32) -> (i32, i32) {
    %c0_i32 = arith.constant 0 : i32
    %c0_i32_0 = arith.constant 0 : i32
    return %arg0, %c0_i32 : i32, i32
  }
  func.func @transform_1(%arg0: i32) -> (i32, i32, i32) {
    %c0_i32 = arith.constant 0 : i32
    %c0_i32_0 = arith.constant 0 : i32
    %c0_i32_1 = arith.constant 0 : i32
    %c0_i32_2 = arith.constant 0 : i32
    return %c0_i32, %c0_i32_0, %c0_i32_1 : i32, i32, i32
  }
  func.func @transform_2(%arg0: i32) -> (i32, i32) {
    %c0_i32 = arith.constant 0 : i32
    %c0_i32_0 = arith.constant 0 : i32
    %c0_i32_1 = arith.constant 0 : i32
    return %c0_i32, %c0_i32_0 : i32, i32
  }
  func.func @transform_3(%arg0: i32) -> (i32, i32) {
    %c0_i32 = arith.constant 0 : i32
    %c0_i32_0 = arith.constant 0 : i32
    return %arg0, %c0_i32 : i32, i32
  }
}

</mosaic_0001>

<bundles_post_ra>
// kernel: global_attention.1
= control target key start
LH: loop header
LB: loop body
LE: loop exit
PB: predicated region body
PF: predicated region fallthrough
CT: control target
= control target key end

     0   :  { %s470_s12 = smov 0   ;;  %s606_s0 = inlined_call_operand.vmem [shape: f32[128,128], index: 0, kind: input, shape index: {}]   ;;  %s607_s1 = inlined_call_operand.vmem [shape: f32[2,128,128], index: 1, kind: input, shape index: {}]   ;;  %s608_s2 = inlined_call_operand.vmem [shape: f32[2,128], index: 2, kind: input, shape index: {}]   ;;  %s609_s3 = inlined_call_operand.vmem [shape: f32[128,128], index: 3, kind: output, shape index: {}]  }
   0x1 LB: > { %s373_s13 = sadd.s32 4294967295, %s448_s12   ;;  %p377_p0 = scmp.ge.s32.totalorder %s448_s12, 1  ;;  %s448_s12 = sphi %s470_s12, %s13_s12  }
   0x2   : > { %p138_p1 = scmp.lt.s32.totalorder %s448_s12, 3 }
   0x4   : > { %p139_p2 = pnand %p377_p0, %p138_p1 }
   0x5   : > { %s378_s30 = sshll.u32 (!%p139_p2), %s373_s13, 3 }
   0x6   : > { %142 = sbr.rel (%p139_p2) target bundleno = 338 (0x152), region = 32  ;;  %p163_p3 = scmp.lt.s32.totalorder (!%p139_p2), %s378_s30, 15 }
   0xb   : > { %v197_v0 = vld [vmem:[%s607_s1 + $0x78] sm:$0xff]  ;;  %v196_v1 = vld [vmem:[%s607_s1 + $0x70] sm:$0xff]  ;;  %v195_v2 = vld [vmem:[%s607_s1 + $0x68] sm:$0xff]  ;;  %s611_s30 = smov (!%p163_p3, %s378_s30), 15 }
   0xc   : > { %400 = vmatpush.msra.mxu2 %v197_v0  ;;  %200 = vmatpush.msra.mxu0 %v197_v0  ;;  %v194_v3 = vld [vmem:[%s607_s1 + $0x60] sm:$0xff]  ;;  %v193_v4 = vld [vmem:[%s607_s1 + $0x58] sm:$0xff]  ;;  %v192_v5 = vld [vmem:[%s607_s1 + $0x50] sm:$0xff]  ;;  %s379_s15 = sshll.u32 %s611_s30, 3 }
   0xd   : > { %v191_v6 = vld [vmem:[%s607_s1 + $0x48] sm:$0xff]  ;;  %v190_v7 = vld [vmem:[%s607_s1 + $0x40] sm:$0xff]  ;;  %v189_v8 = vld [vmem:[%s607_s1 + $0x38] sm:$0xff]  ;;  %s537_s26 = scalar_lea.vmem %s606_s0, %s379_s15  ;;  %s172_s14 = scalar_lea.vmem %s609_s3, %s379_s15 }
   0xe   : > { %401 = vmatpush.msra.mxu2 %v196_v1  ;;  %201 = vmatpush.msra.mxu0 %v196_v1  ;;  %v188_v9 = vld [vmem:[%s607_s1 + $0x30] sm:$0xff]  ;;  %v187_v10 = vld [vmem:[%s607_s1 + $0x28] sm:$0xff]  ;;  %v186_v11 = vld [vmem:[%s607_s1 + $0x20] sm:$0xff] }
   0xf   : > { %v185_v12 = vld [vmem:[%s607_s1 + $0x18] sm:$0xff]  ;;  %v184_v13 = vld [vmem:[%s607_s1 + $0x10] sm:$0xff]  ;;  %v183_v16 = vld [vmem:[%s607_s1 + $0x8] sm:$0xff] }
  0x10   : > { %402 = vmatpush.msra.mxu2 %v195_v2  ;;  %202 = vmatpush.msra.mxu0 %v195_v2  ;;  %v397_v14 = vld [vmem:[%s607_s1 + $0xf8] sm:$0xff]  ;;  %v396_v15 = vld [vmem:[%s607_s1 + $0xf0] sm:$0xff]  ;;  %v395_v17 = vld [vmem:[%s607_s1 + $0xe8] sm:$0xff] }
  0x11   : > { %416 = vmatpush.msra.mxu3 %v397_v14  ;;  %268 = vmatpush.msra.mxu1 %v397_v14  ;;  %v182_v18 = vld [vmem:[%s607_s1] sm:$0xff]  ;;  %v393_v22 = vld [vmem:[%s607_s1 + $0xd8] sm:$0xff]  ;;  %v392_v23 = vld [vmem:[%s607_s1 + $0xd0] sm:$0xff] }
  0x12   : > { %403 = vmatpush.msra.mxu2 %v194_v3  ;;  %203 = vmatpush.msra.mxu0 %v194_v3  ;;  %v178_v19 = vld [vmem:[%s537_s26 + $0x20] sm:$0xff]  ;;  %v391_v24 = vld [vmem:[%s607_s1 + $0xc8] sm:$0xff]  ;;  %v389_v28 = vld [vmem:[%s607_s1 + $0xb8] sm:$0xff] }
  0x13   : > { %417 = vmatpush.msra.mxu3 %v396_v15  ;;  %269 = vmatpush.msra.mxu1 %v396_v15  ;;  %v174_v20 = vld [vmem:[%s537_s26] sm:$0xff]  ;;  %v179_v25 = vld [vmem:[%s537_s26 + $0x28] sm:$0xff]  ;;  %v388_v29 = vld [vmem:[%s607_s1 + $0xb0] sm:$0xff] }
  0x14   : > { %404 = vmatpush.msra.mxu2 %v193_v4  ;;  %204 = vmatpush.msra.mxu0 %v193_v4  ;;  %v394_v21 = vld [vmem:[%s607_s1 + $0xe0] sm:$0xff]  ;;  %v175_v26 = vld [vmem:[%s537_s26 + $0x8] sm:$0xff]  ;;  %v180_v31 = vld [vmem:[%s537_s26 + $0x30] sm:$0xff] }
  0x15   : > { %418 = vmatpush.msra.mxu3 %v395_v17  ;;  %270 = vmatpush.msra.mxu1 %v395_v17  ;;  %v390_v27 = vld [vmem:[%s607_s1 + $0xc0] sm:$0xff]  ;;  %v387_v30 = vld [vmem:[%s607_s1 + $0xa8] sm:$0xff]  ;;  %v176_v32 = vld [vmem:[%s537_s26 + $0x10] sm:$0xff] }
  0x16   : > { %405 = vmatpush.msra.mxu2 %v192_v5  ;;  %205 = vmatpush.msra.mxu0 %v192_v5  ;;  %v386_v33 = vld [vmem:[%s607_s1 + $0xa0] sm:$0xff]  ;;  %v385_v34 = vld [vmem:[%s607_s1 + $0x98] sm:$0xff]  ;;  %v384_v37 = vld [vmem:[%s607_s1 + $0x90] sm:$0xff] }
  0x17   : > { %419 = vmatpush.msra.mxu3 %v394_v21  ;;  %271 = vmatpush.msra.mxu1 %v394_v21  ;;  %v181_v35 = vld [vmem:[%s537_s26 + $0x38] sm:$0xff]  ;;  %v383_v38 = vld [vmem:[%s607_s1 + $0x88] sm:$0xff]  ;;  %v382_v39 = vld [vmem:[%s607_s1 + $0x80] sm:$0xff] }
  0x18   : > { %406 = vmatpush.msra.mxu2 %v191_v6  ;;  %206 = vmatpush.msra.mxu0 %v191_v6  ;;  %v177_v36 = vld [vmem:[%s537_s26 + $0x18] sm:$0xff]  ;;  %v440_v40 = vld [vmem:[%s608_s2] ss:$0 sm:$0xff]  ;;  %v441_v1 = vld [vmem:[%s608_s2 + $0x1] ss:$0 sm:$0xff] }
  0x19   : > { %420 = vmatpush.msra.mxu3 %v393_v22  ;;  %272 = vmatpush.msra.mxu1 %v393_v22 }
  0x1a   : > { %407 = vmatpush.msra.mxu2 %v190_v7  ;;  %207 = vmatpush.msra.mxu0 %v190_v7 }
  0x1b   : > { %421 = vmatpush.msra.mxu3 %v392_v23  ;;  %273 = vmatpush.msra.mxu1 %v392_v23 }
  0x1c   : > { %408 = vmatpush.msra.mxu2 %v189_v8  ;;  %208 = vmatpush.msra.mxu0 %v189_v8 }
  0x1d   : > { %422 = vmatpush.msra.mxu3 %v391_v24  ;;  %274 = vmatpush.msra.mxu1 %v391_v24 }
  0x1e   : > { %409 = vmatpush.msra.mxu2 %v188_v9  ;;  %209 = vmatpush.msra.mxu0 %v188_v9 }
  0x1f   : > { %423 = vmatpush.msra.mxu3 %v390_v27  ;;  %275 = vmatpush.msra.mxu1 %v390_v27 }
  0x20   : > { %410 = vmatpush.msra.mxu2 %v187_v10  ;;  %210 = vmatpush.msra.mxu0 %v187_v10 }
  0x21   : > { %424 = vmatpush.msra.mxu3 %v389_v28  ;;  %276 = vmatpush.msra.mxu1 %v389_v28 }
  0x22   : > { %411 = vmatpush.msra.mxu2 %v186_v11  ;;  %211 = vmatpush.msra.mxu0 %v186_v11 }
  0x23   : > { %425 = vmatpush.msra.mxu3 %v388_v29  ;;  %277 = vmatpush.msra.mxu1 %v388_v29 }
  0x24   : > { %412 = vmatpush.msra.mxu2 %v185_v12  ;;  %212 = vmatpush.msra.mxu0 %v185_v12 }
  0x25   : > { %426 = vmatpush.msra.mxu3 %v387_v30  ;;  %278 = vmatpush.msra.mxu1 %v387_v30 }
  0x26   : > { %413 = vmatpush.msra.mxu2 %v184_v13  ;;  %213 = vmatpush.msra.mxu0 %v184_v13 }
  0x27   : > { %427 = vmatpush.msra.mxu3 %v386_v33  ;;  %279 = vmatpush.msra.mxu1 %v386_v33 }
  0x28   : > { %414 = vmatpush.msra.mxu2 %v183_v16  ;;  %214 = vmatpush.msra.mxu0 %v183_v16 }
  0x29   : > { %428 = vmatpush.msra.mxu3 %v385_v34  ;;  %280 = vmatpush.msra.mxu1 %v385_v34 }
  0x2a   : > { %415 = vmatpush.msra.mxu2 %v182_v18  ;;  %215 = vmatpush.msra.mxu0 %v182_v18 }
  0x2b   : > { %228 = vmatmul.f32.vlgmr.msra.gmra.mxu2 %v178_v19  ;;  %216 = vmatmul.f32.vlgmr.msra.gmra.mxu0 %v174_v20 }
  0x2c   : > { %429 = vmatpush.msra.mxu3 %v384_v37  ;;  %281 = vmatpush.msra.mxu1 %v384_v37 }
  0x2e   : > { %430 = vmatpush.msra.mxu3 %v383_v38  ;;  %282 = vmatpush.msra.mxu1 %v383_v38 }
  0x30   : > { %431 = vmatpush.msra.mxu3 %v382_v39  ;;  %283 = vmatpush.msra.mxu1 %v382_v39 }
  0x33   : > { %231 = vmatmul.f32.gmra.mxu2 %v179_v25  ;;  %219 = vmatmul.f32.gmra.mxu0 %v175_v26 }
  0x3b   : > { %234 = vmatmul.f32.gmra.mxu2 %v180_v31  ;;  %222 = vmatmul.f32.gmra.mxu0 %v176_v32 }
  0x43   : > { %237 = vmatmul.f32.gmra.mxu2 %v181_v35  ;;  %225 = vmatmul.f32.gmra.mxu0 %v177_v36 }
  0xa8   : > { %v217_v41 = vpop.f32.mrf.mxu0 }
  0xa9   : > { %v218_v42 = vadd.f32 %v440_v40, %v217_v41 }
  0xab   : > { %v241_v43 = vmax.f32 %v218_v42, 0.0 }
  0xad   : > { %284 = vmatmul.f32.vlgmr.msra.gmra.mxu1 %v241_v43 }
  0xae   : > { %v229_v44 = vpop.f32.mrf.mxu2 }
  0xaf   : > { %v230_v45 = vadd.f32 %v440_v40, %v229_v44 }
  0xb0   : > { %v220_v46 = vpop.f32.mrf.mxu0 }
  0xb1   : > { %v245_v47 = vmax.f32 %v230_v45, 0.0  ;;  %v221_v48 = vadd.f32 %v440_v40, %v220_v46 }
  0xb3   : > { %296 = vmatmul.f32.vlgmr.msra.gmra.mxu3 %v245_v47  ;;  %v242_v49 = vmax.f32 %v221_v48, 0.0 }
  0xb5   : > { %287 = vmatmul.f32.gmra.mxu1 %v242_v49 }
  0xb6   : > { %v232_v50 = vpop.f32.mrf.mxu2 }
  0xb7   : > { %v233_v51 = vadd.f32 %v440_v40, %v232_v50 }
  0xb8   : > { %v223_v52 = vpop.f32.mrf.mxu0 }
  0xb9   : > { %v246_v53 = vmax.f32 %v233_v51, 0.0  ;;  %v224_v54 = vadd.f32 %v440_v40, %v223_v52 }
  0xbb   : > { %299 = vmatmul.f32.gmra.mxu3 %v246_v53  ;;  %v243_v55 = vmax.f32 %v224_v54, 0.0 }
  0xbd   : > { %290 = vmatmul.f32.gmra.mxu1 %v243_v55 }
  0xbe   : > { %v235_v56 = vpop.f32.mrf.mxu2 }
  0xbf   : > { %v236_v57 = vadd.f32 %v440_v40, %v235_v56 }
  0xc0   : > { %v226_v58 = vpop.f32.mrf.mxu0 }
  0xc1   : > { %v247_v59 = vmax.f32 %v236_v57, 0.0  ;;  %v227_v60 = vadd.f32 %v440_v40, %v226_v58 }
  0xc3   : > { %302 = vmatmul.f32.gmra.mxu3 %v247_v59  ;;  %v244_v61 = vmax.f32 %v227_v60, 0.0 }
  0xc5   : > { %293 = vmatmul.f32.gmra.mxu1 %v244_v61 }
  0xc6   : > { %v238_v62 = vpop.f32.mrf.mxu2 }
  0xc7   : > { %v239_v63 = vadd.f32 %v440_v40, %v238_v62 }
  0xc9   : > { %v248_v0 = vmax.f32 %v239_v63, 0.0 }
  0xcb   : > { %305 = vmatmul.f32.gmra.mxu3 %v248_v0 }
 0x12a   : > { %v285_v2 = vpop.f32.mrf.mxu1 }
 0x12b   : > { %v286_v3 = vadd.f32 %v441_v1, %v285_v2 }
 0x12d   : > { %309 = vst [vmem:[%s172_s14] sm:$0xff] %v286_v3 }
 0x132   : > { %v288_v4 = vpop.f32.mrf.mxu1 }
 0x133   : > { %v289_v5 = vadd.f32 %v441_v1, %v288_v4 }
 0x135   : > { %310 = vst [vmem:[%s172_s14 + $0x8] sm:$0xff] %v289_v5 }
 0x136   : > { %v297_v6 = vpop.f32.mrf.mxu3 }
 0x137   : > { %v298_v7 = vadd.f32 %v441_v1, %v297_v6 }
 0x139   : > { %313 = vst [vmem:[%s172_s14 + $0x20] sm:$0xff] %v298_v7 }
 0x13a   : > { %v291_v8 = vpop.f32.mrf.mxu1 }
 0x13b   : > { %v292_v9 = vadd.f32 %v441_v1, %v291_v8 }
 0x13d   : > { %311 = vst [vmem:[%s172_s14 + $0x10] sm:$0xff] %v292_v9 }
 0x13e   : > { %v300_v10 = vpop.f32.mrf.mxu3 }
 0x13f   : > { %v301_v11 = vadd.f32 %v441_v1, %v300_v10 }
 0x141   : > { %314 = vst [vmem:[%s172_s14 + $0x28] sm:$0xff] %v301_v11 }
 0x142   : > { %v294_v12 = vpop.f32.mrf.mxu1 }
 0x143   : > { %v295_v13 = vadd.f32 %v441_v1, %v294_v12 }
 0x145   : > { %312 = vst [vmem:[%s172_s14 + $0x18] sm:$0xff] %v295_v13 }
 0x146   : > { %v303_v14 = vpop.f32.mrf.mxu3 }
 0x147   : > { %v304_v15 = vadd.f32 %v441_v1, %v303_v14 }
 0x149   : > { %315 = vst [vmem:[%s172_s14 + $0x30] sm:$0xff] %v304_v15 }
 0x14e   : > { %v306_v16 = vpop.f32.mrf.mxu3 }
 0x14f   : > { %v307_v17 = vadd.f32 %v441_v1, %v306_v16 }
 0x151   : > { %316 = vst [vmem:[%s172_s14 + $0x38] sm:$0xff] %v307_v17 }
 0x152 PF: > { %s13_s12 = sadd.s32 1, %s448_s12  }
 0x153   : > { %p10_p4 = scmp.ge.s32.totalorder %s13_s12, 4  }
 0x155   :  { %12 = sbr.rel (!%p10_p4) target bundleno = 1 (0x1), region = 63 }

</bundles_post_ra>
